<compile_context>
chip_gen: v6e
topology: v6e:2x2x1
jax: 0.10.0
libtpu: 0.0.40
codegen_flags: <defaults>
</compile_context>

<pallas_src>
import functools

import jax
import jax.numpy as jnp
import numpy as np
from jax.experimental import pallas as pl
from jax.experimental.pallas import tpu as pltpu


_LANE = 128  # TPU vreg lane width


def _native_sublane(itemsize: int) -> int:
    # f32 -> 8, bf16/f16 -> 16, int8/fp8 -> 32 (packed dtypes pack along sublanes).
    return max(8, 32 // max(itemsize, 1))


def _pick_tile(n: int, unit: int, cap: int):
    """Pick a legal block size for one dimension.

    Returns (tile, num_blocks). `tile` is either the full extent `n` (always a
    legal block dim) or a multiple of `unit`. Exact divisors are preferred so
    every block is dense; if none exists the last block is ragged and handled
    by the pipeline's masked edge (never by materializing a padded copy).
    """
    if n <= cap:
        return n, 1
    cap_u = max(unit, (cap // unit) * unit)
    for t in range(cap_u, 0, -unit):  # trace-time Python, <= ~1k iterations
        if n % t == 0:
            return t, n // t
    return cap_u, (n + cap_u - 1) // cap_u  # ragged last block


def _normalize_kernel(scale_ref, bias_ref, x_ref, out_ref, *, block_rows):
    # scale_ref / bias_ref : (Rp, 1) whole arrays, resident in VMEM
    # x_ref / out_ref      : (TR, TL) image tile
    r0 = pl.multiple_of(pl.program_id(0) * block_rows, block_rows)
    scale = scale_ref[pl.ds(r0, block_rows), :]     # (TR, 1)
    bias = bias_ref[pl.ds(r0, block_rows), :]       # (TR, 1)
    x = x_ref[...]
    out_ref[...] = (x.astype(scale.dtype) * scale + bias).astype(out_ref.dtype)


def normalization_forward(img, mean, std, *,
                          target_tile_bytes=4 * 1024 * 1024,
                          donate_img=False):
    """Computes (img - mean[None,:,None,None]) / std[None,:,None,None].

    img : (N, C, H, W) float array;  mean, std : (C,) float arrays.
    """
    N, C, H, W = img.shape
    R, L = N * C, H * W
    itemsize = jnp.dtype(img.dtype).itemsize
    sublane = _native_sublane(itemsize)

    # bf16 math is native on v6e/v7x; otherwise (and for f32) compute in f32.
    compute_dtype = img.dtype if img.dtype in (jnp.float32, jnp.bfloat16) else jnp.float32

    # Fold the divide into a per-row multiply-add: out = x * (1/std) - mean/std.
    inv_std = 1.0 / std.astype(jnp.float32)
    scale_r = jnp.tile(inv_std, N).astype(compute_dtype)                      # row r -> channel r % C
    bias_r = jnp.tile(-mean.astype(jnp.float32) * inv_std, N).astype(compute_dtype)

    # Lane-dense 2-D view: one row per (batch, channel) plane. Free reshape.
    x2d = img.reshape(R, L)

    # ---- lane tile: full H*W if within budget, else a multiple of 128 ----
    lane_cap = max(_LANE, target_tile_bytes // (sublane * itemsize))
    TL, ncols = _pick_tile(L, _LANE, lane_cap)

    # ---- row tile: as many (batch, channel) rows as keep the tile near target ----
    row_cap = max(sublane, target_tile_bytes // (TL * itemsize))
    TR, nrows = _pick_tile(R, sublane, row_cap)

    # v7x megacore: expose >=2 blocks on a parallel axis when the whole image
    # would otherwise collapse into one big tile (never shrink below ~2 MiB).
    if nrows == 1 and ncols == 1:
        half = TR // 2
        if half >= sublane and half * TL * itemsize >= 2 * 1024 * 1024:
            tr2, nr2 = _pick_tile(R, sublane, half)
            if nr2 >= 2:
                TR, nrows = tr2, nr2

    grid = (nrows, ncols)

    # Per-row affine params stay fully resident in VMEM (a few KiB). Only these
    # tiny (R,1) arrays are padded if the row grid is ragged — never the image.
    Rp = nrows * TR
    if Rp != R:
        scale_r = jnp.pad(scale_r, (0, Rp - R), constant_values=1.0)
        bias_r = jnp.pad(bias_r, (0, Rp - R))
    scale2d = scale_r.reshape(Rp, 1)
    bias2d = bias_r.reshape(Rp, 1)

    kernel = functools.partial(_normalize_kernel, block_rows=TR)

    out2d = pl.pallas_call(
        kernel,
        out_shape=jax.ShapeDtypeStruct((R, L), img.dtype),
        grid=grid,
        in_specs=[
            pl.BlockSpec(memory_space=pltpu.MemorySpace.VMEM),   # scale: resident, untiled
            pl.BlockSpec(memory_space=pltpu.MemorySpace.VMEM),   # bias:  resident, untiled
            pl.BlockSpec((TR, TL), lambda i, j: (i, j)),         # image tile
        ],
        out_specs=pl.BlockSpec((TR, TL), lambda i, j: (i, j)),
        compiler_params=pltpu.CompilerParams(
            dimension_semantics=("parallel", "parallel"),
            vmem_limit_bytes=48 * 1024 * 1024,   # safe on all gens (<= v7x's 64 MiB physical)
        ),
        input_output_aliases=({2: 0} if donate_img else {}),
    )(scale2d, bias2d, x2d)

    return out2d.reshape(N, C, H, W)


if __name__ == "__main__":
    # Deterministic parameters (standard ImageNet normalization constants).
    C = 3
    mean = jnp.array([0.485, 0.456, 0.406], dtype=jnp.float32)
    std = jnp.array([0.229, 0.224, 0.225], dtype=jnp.float32)

    key = jax.random.PRNGKey(0)
    img = jax.random.uniform(key, (2, C, 16, 16), dtype=jnp.float32)

    out = jax.block_until_ready(normalization_forward(img, mean, std))

    # Pure-JAX reference (same broadcast semantics as the PyTorch (C,1,1) views).
    ref = (img - mean.reshape(1, C, 1, 1)) / std.reshape(1, C, 1, 1)
    # Slightly looser rtol: reciprocal-multiply vs. divide differs by a few ulps.
    np.testing.assert_allclose(np.asarray(out), np.asarray(ref), rtol=1e-5, atol=1e-6)

    print("KERNEL_OK")
</pallas_src>

<mosaic_0001>
module attributes {stable_mosaic.version = 11 : i64} {
  func.func @_normalize_kernel(%arg0: i32, %arg1: i32, %arg2: memref<6x1xf32, #tpu.memory_space<vmem>>, %arg3: memref<6x1xf32, #tpu.memory_space<vmem>>, %arg4: memref<6x256xf32, #tpu.memory_space<vmem>>, %arg5: memref<6x256xf32, #tpu.memory_space<vmem>>) attributes {dimension_semantics = [#tpu.dimension_semantics<parallel>, #tpu.dimension_semantics<parallel>], iteration_bounds = array<i64: 1, 1>, scalar_prefetch = 0 : i64, scratch_operands = 0 : i64, tpu.core_type = #tpu.core_type<tc>, window_params = [{pipeline_mode = #tpu.pipeline_mode<synchronous>, transform_indices = @transform_0, window_bounds = array<i64: 6, 1>}, {pipeline_mode = #tpu.pipeline_mode<synchronous>, transform_indices = @transform_1, window_bounds = array<i64: 6, 1>}, {transform_indices = @transform_2, window_bounds = array<i64: 6, 256>}, {transform_indices = @transform_3, window_bounds = array<i64: 6, 256>}]} {
    %c6_i32 = arith.constant 6 : i32
    %0 = arith.muli %arg0, %c6_i32 : i32
    %1 = tpu.assume_multiple %0, 6 : i32
    %2 = arith.index_cast %1 : i32 to index
    %c0 = arith.constant 0 : index
    %3 = vector.load %arg2[%2, %c0] : memref<6x1xf32, #tpu.memory_space<vmem>>, vector<6x1xf32>
    %4 = arith.index_cast %1 : i32 to index
    %c0_0 = arith.constant 0 : index
    %5 = vector.load %arg3[%4, %c0_0] : memref<6x1xf32, #tpu.memory_space<vmem>>, vector<6x1xf32>
    %c0_1 = arith.constant 0 : index
    %c0_2 = arith.constant 0 : index
    %6 = vector.load %arg4[%c0_1, %c0_2] : memref<6x256xf32, #tpu.memory_space<vmem>>, vector<6x256xf32>
    %7 = vector.broadcast %3 : vector<6x1xf32> to vector<6x256xf32>
    %8 = arith.mulf %6, %7 : vector<6x256xf32>
    %9 = vector.broadcast %5 : vector<6x1xf32> to vector<6x256xf32>
    %10 = arith.addf %8, %9 : vector<6x256xf32>
    %c0_3 = arith.constant 0 : index
    %c0_4 = arith.constant 0 : index
    %11 = vector.load %arg5[%c0_3, %c0_4] : memref<6x256xf32, #tpu.memory_space<vmem>>, vector<6x256xf32>
    tpu.vector_store %arg5[%c0_3, %c0_4], %10 {strides = array<i32>} : memref<6x256xf32, #tpu.memory_space<vmem>>, vector<6x256xf32>,
    return
  }
  func.func @transform_0(%arg0: i32, %arg1: i32) -> (i32, i32) {
    %c0_i32 = arith.constant 0 : i32
    %c0_i32_0 = arith.constant 0 : i32
    %c0_i32_1 = arith.constant 0 : i32
    return %c0_i32, %c0_i32_0 : i32, i32
  }
  func.func @transform_1(%arg0: i32, %arg1: i32) -> (i32, i32) {
    %c0_i32 = arith.constant 0 : i32
    %c0_i32_0 = arith.constant 0 : i32
    %c0_i32_1 = arith.constant 0 : i32
    return %c0_i32, %c0_i32_0 : i32, i32
  }
  func.func @transform_2(%arg0: i32, %arg1: i32) -> (i32, i32) {
    %c0_i32 = arith.constant 0 : i32
    return %arg0, %arg1 : i32, i32
  }
  func.func @transform_3(%arg0: i32, %arg1: i32) -> (i32, i32) {
    %c0_i32 = arith.constant 0 : i32
    return %arg0, %arg1 : i32, i32
  }
}

</mosaic_0001>

<bundles_post_ra>
// kernel: tpu_custom_call.1
= control target key start
LH: loop header
LB: loop body
LE: loop exit
PB: predicated region body
PF: predicated region fallthrough
CT: control target
= control target key end

     0   :  { %v77_v1 = vmov 0   ;;  %s114_s0 = inlined_call_operand.vmem [shape: f32[6,1], index: 0, kind: input, shape index: {}]   ;;  %s115_s1 = inlined_call_operand.vmem [shape: f32[6,1], index: 1, kind: input, shape index: {}]   ;;  %s116_s2 = inlined_call_operand.vmem [shape: f32[6,256], index: 2, kind: input, shape index: {}]   ;;  %s117_s3 = inlined_call_operand.hbm [shape: f32[6,256], index: 3, kind: output, shape index: {}]  }
   0x1   :  { %v17_v0 = vld [vmem:[%s114_s0] sm:$0x3f]  ;;  %54 = vset.pattern.permute.xlu0 %v77_v1 }
   0x2   :  { %8 = vsyncpa [#allocation3], 0  ;;  %24 = vperm.xlu0 %54, %v17_v0   ;;  %v19_v2 = vld [vmem:[%s115_s1] sm:$0x3f]  ;;  %v21_v4 = vld [vmem:[%s116_s2 + $0x8] sm:$0x3f] }
   0x3   :  { %v20_v3 = vld [vmem:[%s116_s2] sm:$0x3f]  ;;  %s78_s20 = smov [#allocation2]  }
   0x4   :  { %s44_s0 = sshll.u32 %s78_s20, 4  ;;  %s45_s0 = int_to_ptr.vmem [resolvable:$true] %s44_s0 }
   0x5   :  { %s55_s1 = scalar_lea.vmem %s45_s0, 256  ;;  %p60_p1 = scmp.lt.s32.totalorder %s45_s0, %s45_s0 }
   0x6   :  { %31 = vperm.xlu0 %54, %v19_v2   ;;  %p56_p0 = scmp.ne.s32.totalorder %s45_s0, %s55_s1  ;;  %p61_p2 = scmp.lt.s32.totalorder %s55_s1, %s55_s1 }
   0x8   :  { %p62_p3 = por %p61_p2, %p60_p1 }
   0xa   :  { %p63_p4 = pnand %p62_p3, %p56_p0 }
  0x7d   :  { %v25_v5 = vpop.permute.xlu0 %24 }
  0x7e   :  { %v27_v6 = vmul.f32 %v25_v5, %v20_v3  ;;  %v28_v7 = vmul.f32 %v25_v5, %v21_v4 }
  0x81   :  { %v32_v8 = vpop.permute.xlu0 %31 }
  0x82   :  { %v34_v9 = vadd.f32 %v32_v8, %v27_v6  ;;  %v35_v10 = vadd.f32 %v32_v8, %v28_v7 }
  0x84   :  { %36 = vst [vmem:[#allocation2] sm:$0x3f] %v34_v9  ;;  %37 = vst [vmem:[#allocation2 + $0x8] sm:$0x3f] %v35_v10 }
  0x85   :  { %66 = shalt.err (!%p63_p4)
}
  0x86   :  { %47 = dma.vmem_to_hbm [thread:$0]  %s45_s0, 256, %s117_s3, [#allocation3]  }
  0x87   :  { %75 = dma.done.wait [#allocation3], 256  }
  0x88   :  { %76 = vsyncadd [#allocation3], 4294967040 }
  0x89   :  { %51 = vsyncpa [#allocation3], 1 }

</bundles_post_ra>
